<compile_context>
chip_gen: v6e
topology: v6e:2x2x1
jax: 0.10.0
libtpu: 0.0.40
codegen_flags: <defaults>
</compile_context>

<pallas_src>
import jax
import jax.numpy as jnp
from jax.experimental import pallas as pl
from jax.experimental.pallas import tpu as pltpu

BN_EPS = 1e-5
PAD = 128          # lane-dense width for all hidden features
H3 = 64            # true width of the third hidden layer


def _critic_kernel(x_ref, w1_ref, w2_ref, w3_ref, w4_ref, b_ref, out_ref):
    """3x (Linear[+folded BN] -> ReLU) -> transposed value head, all in VMEM.

    x_ref:  (TILE_B, S)   f32 (cast to bf16 in-kernel)
    w1..w3: bf16, BN-folded, 128-lane padded
    w4_ref: (8, 128) bf16, row 0 = padded head weights, rows 1..7 zero
    b_ref:  (8, 128) f32 packed biases (rows 0..2 layer biases, [3,0] head bias)
    out_ref:(1, TILE_B) f32, value per batch row, lane-dense over batch
    """
    f32 = jnp.float32
    bf16 = jnp.bfloat16

    h = x_ref[...].astype(bf16)                                      # (tb, S)
    y = jnp.dot(h, w1_ref[...], preferred_element_type=f32) + b_ref[0:1, :]
    h = jnp.maximum(y, 0.0).astype(bf16)
    y = jnp.dot(h, w2_ref[...], preferred_element_type=f32) + b_ref[1:2, :]
    h = jnp.maximum(y, 0.0).astype(bf16)
    y = jnp.dot(h, w3_ref[...], preferred_element_type=f32) + b_ref[2:3, :]
    h = jnp.maximum(y, 0.0).astype(bf16)            # (tb, 128), cols 64..127 == 0

    # Value head computed transposed so values land lane-dense over batch:
    # (8, 128) x (tb, 128)^T -> (8, tb); only row 0 is meaningful.
    v = jax.lax.dot_general(
        w4_ref[...], h,
        dimension_numbers=(((1,), (1,)), ((), ())),
        preferred_element_type=f32)                                  # (8, tb)
    out_ref[...] = (v[0:1, :] + b_ref[3:4, 0:1]).astype(out_ref.dtype)


def _fold_bn(w, b, gamma, beta, mean, var):
    """Fold eval-mode BatchNorm1d into the preceding Linear (exact)."""
    scale = gamma * jax.lax.rsqrt(var + BN_EPS)          # (out,)
    return w * scale[None, :], (b - mean) * scale + beta


def _pack_params(params):
    """BN-fold, pad to 128 lanes, cast matmul weights to bf16, pack biases."""
    l1, l2, l3 = params["hidden"]
    w1, b1 = _fold_bn(l1["w"], l1["b"], l1["gamma"], l1["beta"], l1["mean"], l1["var"])
    w2, b2 = _fold_bn(l2["w"], l2["b"], l2["gamma"], l2["beta"], l2["mean"], l2["var"])
    w3, b3 = _fold_bn(l3["w"], l3["b"], l3["gamma"], l3["beta"], l3["mean"], l3["var"])
    w4, b4 = params["head"]["w"], params["head"]["b"]

    w3p = jnp.pad(w3, ((0, 0), (0, PAD - H3)))                     # (128, 128)
    # Head weights stored transposed in row 0 of an (8, 128) tile (rows 1..7
    # zero) so the in-kernel head matmul has a native 8-sublane LHS.
    w4_row = jnp.zeros((8, PAD), jnp.float32).at[0, :H3].set(w4[:, 0])

    bias = jnp.zeros((8, PAD), jnp.float32)
    bias = bias.at[0, :].set(b1)
    bias = bias.at[1, :].set(b2)
    bias = bias.at[2, :H3].set(b3)
    bias = bias.at[3, 0].set(b4[0])

    to_bf16 = lambda a: a.astype(jnp.bfloat16)
    return to_bf16(w1), to_bf16(w2), to_bf16(w3p), to_bf16(w4_row), bias


def _round_up(a, m):
    return (a + m - 1) // m * m


def critic_forward(x, params, tile_b=512):
    """x: (batch, state_size) float32. Returns (batch, 1) float32."""
    batch, state_size = x.shape
    w1, w2, w3, w4, bias = _pack_params(params)

    # Batch tiling: small batches -> one tile rounded up to 8 sublanes (f32
    # min tile); large batches -> stream tile_b-row blocks.  batch > tile_b
    # always yields >= 2 grid steps, so the "parallel" batch axis can shard
    # across both TensorCores on v7x.
    tb = _round_up(max(batch, 1), 8) if batch <= tile_b else tile_b
    padded_b = _round_up(batch, tb)
    if padded_b != batch:
        x = jnp.pad(x, ((0, padded_b - batch), (0, 0)))

    grid = (padded_b // tb,)
    resident = lambda shape: pl.BlockSpec(shape, lambda i: (0, 0))

    flops = int(2 * padded_b * (state_size * PAD + 2 * PAD * PAD + PAD * 8))
    bytes_accessed = int(
        x.size * 4
        + (w1.size + w2.size + w3.size + w4.size) * 2
        + bias.size * 4
        + padded_b * 4)

    out = pl.pallas_call(
        _critic_kernel,
        out_shape=jax.ShapeDtypeStruct((1, padded_b), jnp.float32),
        grid=grid,
        in_specs=[
            pl.BlockSpec((tb, state_size), lambda i: (i, 0)),   # activations stream
            resident(w1.shape),
            resident(w2.shape),
            resident(w3.shape),
            resident(w4.shape),
            resident(bias.shape),
        ],
        out_specs=pl.BlockSpec((1, tb), lambda i: (0, i)),
        compiler_params=pltpu.CompilerParams(
            dimension_semantics=("parallel",)),
        cost_estimate=pl.CostEstimate(
            flops=flops, transcendentals=0, bytes_accessed=bytes_accessed),
    )(x, w1, w2, w3, w4, bias)

    return out[0, :batch].reshape(batch, 1)


def init_params(key, state_size):
    """Deterministic synthetic parameters matching the PyTorch module's shapes
    (Linear weights stored pre-transposed as (in, out))."""
    dims = [(state_size, 128), (128, 128), (128, H3)]
    hidden = []
    for fan_in, fan_out in dims:
        key, kw, kb, kg, kbe, km, kv = jax.random.split(key, 7)
        bound = 1.0 / jnp.sqrt(fan_in)
        hidden.append(dict(
            w=jax.random.uniform(kw, (fan_in, fan_out), jnp.float32, -bound, bound),
            b=jax.random.uniform(kb, (fan_out,), jnp.float32, -bound, bound),
            gamma=jax.random.uniform(kg, (fan_out,), jnp.float32, 0.5, 1.5),
            beta=0.1 * jax.random.normal(kbe, (fan_out,), jnp.float32),
            mean=0.1 * jax.random.normal(km, (fan_out,), jnp.float32),
            var=jax.random.uniform(kv, (fan_out,), jnp.float32, 0.5, 1.5),
        ))
    key, kw, kb = jax.random.split(key, 3)
    bound = 1.0 / jnp.sqrt(H3)
    head = dict(
        w=jax.random.uniform(kw, (H3, 1), jnp.float32, -bound, bound),
        b=jax.random.uniform(kb, (1,), jnp.float32, -bound, bound),
    )
    return dict(hidden=hidden, head=head)


def reference_forward(x, params):
    """Pure-JAX reference: same eval-mode BN fold and bf16 matmul casts as the
    kernel (the fold itself is exact w.r.t. the module's eval-mode math)."""
    h = x.astype(jnp.bfloat16)
    for layer in params["hidden"]:
        w, b = _fold_bn(layer["w"], layer["b"], layer["gamma"], layer["beta"],
                        layer["mean"], layer["var"])
        y = jnp.dot(h, w.astype(jnp.bfloat16),
                    preferred_element_type=jnp.float32) + b
        h = jnp.maximum(y, 0.0).astype(jnp.bfloat16)
    return (jnp.dot(h, params["head"]["w"].astype(jnp.bfloat16),
                    preferred_element_type=jnp.float32)
            + params["head"]["b"])


if __name__ == "__main__":
    key = jax.random.PRNGKey(0)
    key, kx = jax.random.split(key)

    state_size = 32
    batch = 8
    x = jax.random.normal(kx, (batch, state_size), jnp.float32)

    params = init_params(key, state_size)

    out = jax.block_until_ready(critic_forward(x, params))
    ref = reference_forward(x, params)

    assert out.shape == (batch, 1)
    assert jnp.allclose(out, ref, atol=1e-3, rtol=1e-3), "mismatch vs reference"

    print("KERNEL_OK")
</pallas_src>

<mosaic_0001>
module attributes {stable_mosaic.version = 11 : i64} {
  func.func @_critic_kernel(%arg0: i32, %arg1: memref<8x32xf32, #tpu.memory_space<vmem>>, %arg2: memref<32x128xbf16, #tpu.memory_space<vmem>>, %arg3: memref<128x128xbf16, #tpu.memory_space<vmem>>, %arg4: memref<128x128xbf16, #tpu.memory_space<vmem>>, %arg5: memref<8x128xbf16, #tpu.memory_space<vmem>>, %arg6: memref<8x128xf32, #tpu.memory_space<vmem>>, %arg7: memref<1x8xf32, #tpu.memory_space<vmem>>) attributes {dimension_semantics = [#tpu.dimension_semantics<parallel>], iteration_bounds = array<i64: 1>, scalar_prefetch = 0 : i64, scratch_operands = 0 : i64, tpu.core_type = #tpu.core_type<tc>, window_params = [{transform_indices = @transform_0, window_bounds = array<i64: 8, 32>}, {pipeline_mode = #tpu.pipeline_mode<synchronous>, transform_indices = @transform_1, window_bounds = array<i64: 32, 128>}, {pipeline_mode = #tpu.pipeline_mode<synchronous>, transform_indices = @transform_2, window_bounds = array<i64: 128, 128>}, {pipeline_mode = #tpu.pipeline_mode<synchronous>, transform_indices = @transform_3, window_bounds = array<i64: 128, 128>}, {pipeline_mode = #tpu.pipeline_mode<synchronous>, transform_indices = @transform_4, window_bounds = array<i64: 8, 128>}, {pipeline_mode = #tpu.pipeline_mode<synchronous>, transform_indices = @transform_5, window_bounds = array<i64: 8, 128>}, {transform_indices = @transform_6, window_bounds = array<i64: 1, 8>}]} {
    %c0 = arith.constant 0 : index
    %c0_0 = arith.constant 0 : index
    %0 = vector.load %arg1[%c0, %c0_0] : memref<8x32xf32, #tpu.memory_space<vmem>>, vector<8x32xf32>
    %1 = arith.truncf %0 : vector<8x32xf32> to vector<8x32xbf16>
    %c0_1 = arith.constant 0 : index
    %c0_2 = arith.constant 0 : index
    %2 = vector.load %arg2[%c0_1, %c0_2] : memref<32x128xbf16, #tpu.memory_space<vmem>>, vector<32x128xbf16>
    %cst = arith.constant dense<0.000000e+00> : vector<8x128xf32>
    %3 = tpu.matmul %1, %2, %cst {dimension_numbers = #tpu.dot_dimension_numbers<[1], [0], [0], [1], [0, 0, 1, 1], [], []>} : vector<8x32xbf16>, vector<32x128xbf16>, vector<8x128xf32> -> vector<8x128xf32>
    %c0_3 = arith.constant 0 : index
    %c0_4 = arith.constant 0 : index
    %4 = vector.load %arg6[%c0_3, %c0_4] : memref<8x128xf32, #tpu.memory_space<vmem>>, vector<1x128xf32>
    %5 = vector.broadcast %4 : vector<1x128xf32> to vector<8x128xf32>
    %6 = arith.addf %3, %5 : vector<8x128xf32>
    %cst_5 = arith.constant 0.000000e+00 : f32
    %7 = vector.broadcast %cst_5 : f32 to vector<8x128xf32>
    %8 = arith.maximumf %6, %7 : vector<8x128xf32>
    %9 = arith.truncf %8 : vector<8x128xf32> to vector<8x128xbf16>
    %c0_6 = arith.constant 0 : index
    %c0_7 = arith.constant 0 : index
    %10 = vector.load %arg3[%c0_6, %c0_7] : memref<128x128xbf16, #tpu.memory_space<vmem>>, vector<128x128xbf16>
    %cst_8 = arith.constant dense<0.000000e+00> : vector<8x128xf32>
    %11 = tpu.matmul %9, %10, %cst_8 {dimension_numbers = #tpu.dot_dimension_numbers<[1], [0], [0], [1], [0, 0, 1, 1], [], []>} : vector<8x128xbf16>, vector<128x128xbf16>, vector<8x128xf32> -> vector<8x128xf32>
    %c1 = arith.constant 1 : index
    %c0_9 = arith.constant 0 : index
    %12 = vector.load %arg6[%c1, %c0_9] : memref<8x128xf32, #tpu.memory_space<vmem>>, vector<1x128xf32>
    %13 = vector.broadcast %12 : vector<1x128xf32> to vector<8x128xf32>
    %14 = arith.addf %11, %13 : vector<8x128xf32>
    %cst_10 = arith.constant 0.000000e+00 : f32
    %15 = vector.broadcast %cst_10 : f32 to vector<8x128xf32>
    %16 = arith.maximumf %14, %15 : vector<8x128xf32>
    %17 = arith.truncf %16 : vector<8x128xf32> to vector<8x128xbf16>
    %c0_11 = arith.constant 0 : index
    %c0_12 = arith.constant 0 : index
    %18 = vector.load %arg4[%c0_11, %c0_12] : memref<128x128xbf16, #tpu.memory_space<vmem>>, vector<128x128xbf16>
    %cst_13 = arith.constant dense<0.000000e+00> : vector<8x128xf32>
    %19 = tpu.matmul %17, %18, %cst_13 {dimension_numbers = #tpu.dot_dimension_numbers<[1], [0], [0], [1], [0, 0, 1, 1], [], []>} : vector<8x128xbf16>, vector<128x128xbf16>, vector<8x128xf32> -> vector<8x128xf32>
    %c2 = arith.constant 2 : index
    %c0_14 = arith.constant 0 : index
    %20 = vector.load %arg6[%c2, %c0_14] : memref<8x128xf32, #tpu.memory_space<vmem>>, vector<1x128xf32>
    %21 = vector.broadcast %20 : vector<1x128xf32> to vector<8x128xf32>
    %22 = arith.addf %19, %21 : vector<8x128xf32>
    %cst_15 = arith.constant 0.000000e+00 : f32
    %23 = vector.broadcast %cst_15 : f32 to vector<8x128xf32>
    %24 = arith.maximumf %22, %23 : vector<8x128xf32>
    %25 = arith.truncf %24 : vector<8x128xf32> to vector<8x128xbf16>
    %c0_16 = arith.constant 0 : index
    %c0_17 = arith.constant 0 : index
    %26 = vector.load %arg5[%c0_16, %c0_17] : memref<8x128xbf16, #tpu.memory_space<vmem>>, vector<8x128xbf16>
    %cst_18 = arith.constant dense<0.000000e+00> : vector<8x8xf32>
    %27 = tpu.matmul %26, %25, %cst_18 {dimension_numbers = #tpu.dot_dimension_numbers<[1], [1], [0], [0], [0, 0, 1, 0], [], []>} : vector<8x128xbf16>, vector<8x128xbf16>, vector<8x8xf32> -> vector<8x8xf32>
    %28 = vector.extract_strided_slice %27 {offsets = [0, 0], sizes = [1, 8], strides = [1, 1]} : vector<8x8xf32> to vector<1x8xf32>
    %c3 = arith.constant 3 : index
    %c0_19 = arith.constant 0 : index
    %29 = vector.load %arg6[%c3, %c0_19] : memref<8x128xf32, #tpu.memory_space<vmem>>, vector<1x1xf32>
    %30 = vector.broadcast %29 : vector<1x1xf32> to vector<1x8xf32>
    %31 = arith.addf %28, %30 : vector<1x8xf32>
    %c0_20 = arith.constant 0 : index
    %c0_21 = arith.constant 0 : index
    %32 = vector.load %arg7[%c0_20, %c0_21] : memref<1x8xf32, #tpu.memory_space<vmem>>, vector<1x8xf32>
    tpu.vector_store %arg7[%c0_20, %c0_21], %31 {strides = array<i32>} : memref<1x8xf32, #tpu.memory_space<vmem>>, vector<1x8xf32>,
    return
  }
  func.func @transform_0(%arg0: i32) -> (i32, i32) {
    %c0_i32 = arith.constant 0 : i32
    %c0_i32_0 = arith.constant 0 : i32
    return %arg0, %c0_i32 : i32, i32
  }
  func.func @transform_1(%arg0: i32) -> (i32, i32) {
    %c0_i32 = arith.constant 0 : i32
    %c0_i32_0 = arith.constant 0 : i32
    %c0_i32_1 = arith.constant 0 : i32
    return %c0_i32, %c0_i32_0 : i32, i32
  }
  func.func @transform_2(%arg0: i32) -> (i32, i32) {
    %c0_i32 = arith.constant 0 : i32
    %c0_i32_0 = arith.constant 0 : i32
    %c0_i32_1 = arith.constant 0 : i32
    return %c0_i32, %c0_i32_0 : i32, i32
  }
  func.func @transform_3(%arg0: i32) -> (i32, i32) {
    %c0_i32 = arith.constant 0 : i32
    %c0_i32_0 = arith.constant 0 : i32
    %c0_i32_1 = arith.constant 0 : i32
    return %c0_i32, %c0_i32_0 : i32, i32
  }
  func.func @transform_4(%arg0: i32) -> (i32, i32) {
    %c0_i32 = arith.constant 0 : i32
    %c0_i32_0 = arith.constant 0 : i32
    %c0_i32_1 = arith.constant 0 : i32
    return %c0_i32, %c0_i32_0 : i32, i32
  }
  func.func @transform_5(%arg0: i32) -> (i32, i32) {
    %c0_i32 = arith.constant 0 : i32
    %c0_i32_0 = arith.constant 0 : i32
    %c0_i32_1 = arith.constant 0 : i32
    return %c0_i32, %c0_i32_0 : i32, i32
  }
  func.func @transform_6(%arg0: i32) -> (i32, i32) {
    %c0_i32 = arith.constant 0 : i32
    %c0_i32_0 = arith.constant 0 : i32
    return %c0_i32, %arg0 : i32, i32
  }
}

</mosaic_0001>

<bundles_post_ra>
// kernel: tpu_custom_call.1
= control target key start
LH: loop header
LB: loop body
LE: loop exit
PB: predicated region body
PF: predicated region fallthrough
CT: control target
= control target key end

     0   :  { %11 = vsyncpa [#allocation3], 0  ;;  %s816_s0 = inlined_call_operand.hbm [shape: f32[8,32], index: 0, kind: input, shape index: {}]   ;;  %s817_s1 = inlined_call_operand.hbm [shape: bf16[32,128], index: 1, kind: input, shape index: {}]   ;;  %s818_s2 = inlined_call_operand.hbm [shape: bf16[128,128], index: 2, kind: input, shape index: {}]   ;;  %s819_s3 = inlined_call_operand.hbm [shape: bf16[128,128], index: 3, kind: input, shape index: {}]   ;;  %s820_s4 = inlined_call_operand.hbm [shape: bf16[8,128], index: 4, kind: input, shape index: {}]   ;;  %s821_s5 = inlined_call_operand.vmem [shape: f32[8,128], index: 5, kind: input, shape index: {}]   ;;  %s822_s6 = inlined_call_operand.hbm [shape: f32[1,8], index: 6, kind: output, shape index: {}]  }
   0x1   :  { %12 = vsyncpa [#allocation6], 0 }
   0x2   :  { %13 = vsyncpa [#allocation9], 0 }
   0x3   :  { %14 = vsyncpa [#allocation4], 0  ;;  %s704_s21 = smov [#allocation5]  }
   0x4   :  { %s30_s22 = sshll.u32 %s704_s21, 4  ;;  %s31_s22 = int_to_ptr.vmem [resolvable:$true] %s30_s22 }
   0x5   :  { %s584_s23 = scalar_lea.vmem %s31_s22, 256  ;;  %p589_p1 = scmp.lt.s32.totalorder %s31_s22, %s31_s22 }
   0x6   :  { %p585_p0 = scmp.ne.s32.totalorder %s31_s22, %s584_s23  ;;  %p590_p2 = scmp.lt.s32.totalorder %s584_s23, %s584_s23 }
   0x8   :  { %p591_p3 = por %p590_p2, %p589_p1 }
   0xa   :  { %p592_p4 = pnand %p591_p3, %p585_p0 }
   0xc   :  { %595 = shalt.err (!%p592_p4)
}
   0xd   :  { %s705_s24 = smov 64   ;;  %s706_s25 = smov 4  }
   0xe   :  { %36 = dma.hbm_to_vmem [thread:$0]  %s817_s1, 256, %s31_s22, [#allocation6], %s705_s24, %s705_s24, %s706_s25  }
   0xf   :  { %s707_s28 = smov [#allocation8]   ;;  %s708_s30 = smov [#allocation2]  }
  0x10   :  { %s54_s29 = sshll.u32 %s707_s28, 4  ;;  %s21_s7 = sshll.u32 %s708_s30, 4  ;;  %s55_s29 = int_to_ptr.vmem [resolvable:$true] %s54_s29  ;;  %s22_s7 = int_to_ptr.vmem [resolvable:$true] %s21_s7 }
  0x11   :  { %s604_s8 = scalar_lea.vmem %s55_s29, 1024  ;;  %p609_p6 = scmp.lt.s32.totalorder %s55_s29, %s55_s29 }
  0x12   :  { %p605_p5 = scmp.ne.s32.totalorder %s55_s29, %s604_s8  ;;  %p610_p7 = scmp.lt.s32.totalorder %s604_s8, %s604_s8 }
  0x14   :  { %p611_p8 = por %p610_p7, %p609_p6 }
  0x16   :  { %p612_p9 = pnand %p611_p8, %p605_p5 }
  0x18   :  { %615 = shalt.err (!%p612_p9)
}
  0x19   :  { %60 = dma.hbm_to_vmem [thread:$0]  %s819_s3, 1024, %s55_s29, [#allocation9], %s705_s24, %s705_s24, %s706_s25  }
  0x1a   :  { %s624_s1 = scalar_lea.vmem %s22_s7, 128  ;;  %p629_p11 = scmp.lt.s32.totalorder %s22_s7, %s22_s7 }
  0x1b   :  { %p625_p10 = scmp.ne.s32.totalorder %s22_s7, %s624_s1  ;;  %p630_p12 = scmp.lt.s32.totalorder %s624_s1, %s624_s1 }
  0x1d   :  { %p631_p13 = por %p630_p12, %p629_p11 }
  0x1f   :  { %p632_p0 = pnand %p631_p13, %p625_p10 }
  0x21   :  { %635 = shalt.err (!%p632_p0)
}
  0x22   :  { %24 = dma.hbm_to_vmem [thread:$0]  %s816_s0, 128, %s22_s7, [#allocation3]  }
  0x23   :  { %s709_s13 = smov [#allocation7]   ;;  %s710_s15 = smov [#allocation10]  }
  0x24   :  { %s42_s14 = sshll.u32 %s709_s13, 4  ;;  %s67_s16 = sshll.u32 %s710_s15, 4  ;;  %s43_s14 = int_to_ptr.vmem [resolvable:$true] %s42_s14  ;;  %s68_s16 = int_to_ptr.vmem [resolvable:$true] %s67_s16 }
  0x25   :  { %s644_s17 = scalar_lea.vmem %s43_s14, 1024  ;;  %p649_p2 = scmp.lt.s32.totalorder %s43_s14, %s43_s14 }
  0x26   :  { %p645_p1 = scmp.ne.s32.totalorder %s43_s14, %s644_s17  ;;  %p650_p3 = scmp.lt.s32.totalorder %s644_s17, %s644_s17 }
  0x28   :  { %p651_p4 = por %p650_p3, %p649_p2 }
  0x2a   :  { %p652_p5 = pnand %p651_p4, %p645_p1 }
  0x2c   :  { %655 = shalt.err (!%p652_p5)
}
  0x2d   :  { %48 = dma.hbm_to_vmem [thread:$0]  %s818_s2, 1024, %s43_s14, [#allocation6], %s705_s24, %s705_s24, %s706_s25  }
  0x2e   :  { %s664_s0 = scalar_lea.vmem %s68_s16, 64  ;;  %p669_p7 = scmp.lt.s32.totalorder %s68_s16, %s68_s16 }
  0x2f   :  { %p665_p6 = scmp.ne.s32.totalorder %s68_s16, %s664_s0  ;;  %p670_p8 = scmp.lt.s32.totalorder %s664_s0, %s664_s0 }
  0x31   :  { %p671_p9 = por %p670_p8, %p669_p7 }
  0x33   :  { %p672_p10 = pnand %p671_p9, %p665_p6 }
  0x35   :  { %675 = shalt.err (!%p672_p10)
}
  0x36   :  { %70 = dma.hbm_to_vmem [thread:$0]  %s820_s4, 64, %s68_s16, [#allocation9]  }
  0x37   :  { %696 = dma.done.wait [#allocation3], 128  }
  0x38   :  { %697 = vsyncadd [#allocation3], 4294967168 }
  0x39   :  { %698 = dma.done.wait [#allocation6], 1280  }
  0x3a   :  { %699 = vsyncadd [#allocation6], 4294966016 }
  0x3b   :  { %700 = dma.done.wait [#allocation9], 1088  }
  0x3c   :  { %701 = vsyncadd [#allocation9], 4294966208  ;;  %v711_v0 = vmov 0.0   ;;  %vm712_vm0 = vmmov 0   ;;  %v558_v1 = vld [vmem:[#allocation5 + $0x8] sm:$0xff]   ;;  %v559_v2 = vld [vmem:[#allocation5] sm:$0xff]  }
  0x3d   :  { %492 = vmatprep.subr.bf16.mxu0 %v711_v0  ;;  %496 = vmatprep.mubr.msk.bf16.mxu0 %vm712_vm0, %v711_v0  ;;  %v89_v3 = vld [vmem:[#allocation2] sm:$0xff]  ;;  %v560_v4 = vld [vmem:[#allocation7 + $0x38] sm:$0xff]   ;;  %v561_v6 = vld [vmem:[#allocation7 + $0x30] sm:$0xff]   ;;  %vm112_vm1 = vcmask 261120   ;;  %v713_v38 = vmov 0   ;;  %s714_s27 = smov [#allocation11]  }
  0x3e   :  { %500 = vmatprep.subr.bf16.mxu1 %v711_v0  ;;  %516 = vmatprep.mubr.msk.bf16.mxu1 %vm712_vm0, %v711_v0  ;;  %v90_v5 = vpack.c.bf16 %v89_v3, %v89_v3  ;;  %v562_v7 = vld [vmem:[#allocation7 + $0x28] sm:$0xff]   ;;  %v563_v8 = vld [vmem:[#allocation7 + $0x20] sm:$0xff]   ;;  %v564_v9 = vld [vmem:[#allocation7 + $0x18] sm:$0xff]   ;;  %s436_s28 = sshll.u32 %s714_s27, 4  ;;  %vm428_vm2 = vcmask 57344   ;;  %s437_s28 = int_to_ptr.vmem [resolvable:$true] %s436_s28 }
  0x3f   :  { %493 = vmatpush3.bf16.msra.mxu0 %v558_v1  ;;  %501 = vmatpush3.bf16.msra.mxu1 %v560_v4  ;;  %v565_v10 = vld [vmem:[#allocation7 + $0x10] sm:$0xff]   ;;  %v566_v11 = vld [vmem:[#allocation7 + $0x8] sm:$0xff]   ;;  %v567_v12 = vld [vmem:[#allocation7] sm:$0xff]   ;;  %s680_s29 = scalar_lea.vmem %s437_s28, 32  ;;  %p681_p12 = scmp.lt.s32.totalorder %s437_s28, %s437_s28 }
  0x40   :  { %494 = vmatprep.subr.bf16.mxu0 %v711_v0  ;;  %502 = vmatprep.subr.bf16.mxu1 %v711_v0  ;;  %v568_v13 = vld [vmem:[#allocation8 + $0x38] sm:$0xff]   ;;  %v569_v14 = vld [vmem:[#allocation8 + $0x30] sm:$0xff]   ;;  %v570_v15 = vld [vmem:[#allocation8 + $0x28] sm:$0xff]  }
  0x41   :  { %v571_v16 = vld [vmem:[#allocation8 + $0x20] sm:$0xff]   ;;  %v572_v17 = vld [vmem:[#allocation8 + $0x18] sm:$0xff]   ;;  %v573_v18 = vld [vmem:[#allocation8 + $0x10] sm:$0xff]   ;;  %557 = vset.pattern.permute.xlu0 %v713_v38 }
  0x42   :  { %v447_v19 = vld [vmem:[%s821_s5] ss:$0 sm:$0xff]  ;;  %v575_v28 = vld [vmem:[#allocation8] sm:$0xff]   ;;  %v451_v29 = vld [vmem:[%s821_s5 + $0x1] ss:$0 sm:$0xff] }
  0x43   :  { %495 = vmatpush3.bf16.msra.mxu0 %v559_v2  ;;  %503 = vmatpush3.bf16.msra.mxu1 %v561_v6  ;;  %v574_v27 = vld [vmem:[#allocation8 + $0x8] sm:$0xff]   ;;  %v380_v47 = vld [vmem:[#allocation10] sm:$0xf] }
  0x44   :  { %520 = vmatprep.subr.bf16.mxu0 %v711_v0  ;;  %504 = vmatprep.subr.bf16.mxu1 %v711_v0  ;;  %v421_v37 = vld [vmem:[%s821_s5 + $0x3] sm:$0x1]  ;;  %v460_v39 = vld [vmem:[%s821_s5 + $0x2] ss:$0 sm:$0xff]  ;;  %s676_s5 = scalar_lea.vmem %s437_s28, 16 }
  0x45   :  { %424 = vperm.xlu0 %557, %v421_v37   ;;  %p677_p11 = scmp.ne.s32.totalorder %s437_s28, %s676_s5  ;;  %p682_p13 = scmp.lt.s32.totalorder %s680_s29, %s676_s5 }
  0x46   :  { %497 = vmatmul.mubr.msk.bf16.vlgmr.msra.gmra.mxu0 %vm112_vm1, %v90_v5 }
  0x47   :  { %536 = vmatprep.mubr.msk.bf16.mxu0 %vm712_vm0, %v711_v0  ;;  %505 = vmatpush3.bf16.msra.mxu1 %v562_v7  ;;  %p683_p0 = por %p682_p13, %p681_p12 }
  0x48   :  { %506 = vmatprep.subr.bf16.mxu1 %v711_v0  ;;  %521 = vmatpush3.bf16.msra.mxu0 %v568_v13 }
  0x49   :  { %522 = vmatprep.subr.bf16.mxu0 %v711_v0  ;;  %p684_p1 = pnand %p683_p0, %p677_p11 }
  0x4b   :  { %507 = vmatpush3.bf16.msra.mxu1 %v563_v8 }
  0x4c   :  { %508 = vmatprep.subr.bf16.mxu1 %v711_v0  ;;  %523 = vmatpush3.bf16.msra.mxu0 %v569_v14 }
  0x4d   :  { %524 = vmatprep.subr.bf16.mxu0 %v711_v0 }
  0x4f   :  { %509 = vmatpush3.bf16.msra.mxu1 %v564_v9 }
  0x50   :  { %510 = vmatprep.subr.bf16.mxu1 %v711_v0  ;;  %525 = vmatpush3.bf16.msra.mxu0 %v570_v15 }
  0x51   :  { %526 = vmatprep.subr.bf16.mxu0 %v711_v0 }
  0x53   :  { %511 = vmatpush3.bf16.msra.mxu1 %v565_v10 }
  0x54   :  { %512 = vmatprep.subr.bf16.mxu1 %v711_v0  ;;  %527 = vmatpush3.bf16.msra.mxu0 %v571_v16 }
  0x55   :  { %528 = vmatprep.subr.bf16.mxu0 %v711_v0 }
  0x57   :  { %513 = vmatpush3.bf16.msra.mxu1 %v566_v11 }
  0x58   :  { %514 = vmatprep.subr.bf16.mxu1 %v711_v0  ;;  %529 = vmatpush3.bf16.msra.mxu0 %v572_v17 }
  0x59   :  { %530 = vmatprep.subr.bf16.mxu0 %v711_v0 }
  0x5b   :  { %515 = vmatpush3.bf16.msra.mxu1 %v567_v12 }
  0x5c   :  { %540 = vmatprep.subr.bf16.mxu1 %v711_v0  ;;  %531 = vmatpush3.bf16.msra.mxu0 %v573_v18 }
  0x5d   :  { %532 = vmatprep.subr.bf16.mxu0 %v711_v0 }
  0x60   :  { %533 = vmatpush3.bf16.msra.mxu0 %v574_v27 }
  0x61   :  { %534 = vmatprep.subr.bf16.mxu0 %v711_v0 }
  0x64   :  { %535 = vmatpush3.bf16.msra.mxu0 %v575_v28 }
  0xc0   :  { %v425_v48 = vpop.permute.xlu0 %424 }
 0x106   :  { %v150_v20 = vpop.f32.mrf.mxu0 }
 0x107   :  { %v151_v21 = vadd.f32 %v447_v19, %v150_v20 }
 0x108   :  { %v498_v22 = vpop.f32.mrf.mxu0 }
 0x109   :  { %v156_v23 = vmax.f32 %v151_v21, 0.0 }
 0x10a   :  { %v153_v24 = vpop.f32.mrf.mxu0 }
 0x10b   :  { %v157_v25 = vpack.c.bf16 %v156_v23, %v156_v23 }
 0x10c   :  { %v499_v26 = vpop.f32.mrf.mxu0 }
 0x10d   :  { %517 = vmatmul.mubr.bf16.vlgmr.msra.gmra.mxu1 %v157_v25 }
 0x10e   :  { %542 = vmatprep.mubr.msk.bf16.mxu1 %vm712_vm0, %v711_v0 }
 0x1cd   :  { %v261_v30 = vpop.f32.mrf.mxu1 }
 0x1ce   :  { %v262_v31 = vadd.f32 %v451_v29, %v261_v30 }
 0x1cf   :  { %v518_v32 = vpop.f32.mrf.mxu1 }
 0x1d0   :  { %v267_v33 = vmax.f32 %v262_v31, 0.0 }
 0x1d1   :  { %v264_v34 = vpop.f32.mrf.mxu1 }
 0x1d2   :  { %v268_v35 = vpack.c.bf16 %v267_v33, %v267_v33 }
 0x1d3   :  { %v519_v36 = vpop.f32.mrf.mxu1 }
 0x1d4   :  { %537 = vmatmul.mubr.bf16.vlgmr.msra.gmra.mxu0 %v268_v35 }
 0x294   :  { %v372_v40 = vpop.f32.mrf.mxu0 }
 0x295   :  { %v373_v41 = vadd.f32 %v460_v39, %v372_v40 }
 0x296   :  { %v538_v42 = vpop.f32.mrf.mxu0 }
 0x297   :  { %v378_v43 = vmax.f32 %v373_v41, 0.0 }
 0x298   :  { %v375_v44 = vpop.f32.mrf.mxu0 }
 0x299   :  { %v379_v45 = vpack.c.bf16 %v378_v43, %v378_v43 }
 0x29a   :  { %v539_v46 = vpop.f32.mrf.mxu0 }
 0x29b   :  { %541 = vmatpush3.bf16.xpose.msra.mxu1 %v379_v45 }
 0x2a2   :  { %543 = vmatmul.mubr.bf16.vlgmr.msra.gmra.mxu1 %v380_v47 }
 0x362   :  { %v415_v49 = vpop.f32.mrf.mxu1 }
 0x363   :  { %v427_v50 = vadd.f32 %v425_v48, %v415_v49 }
 0x364   :  { %v544_v51 = vpop.f32.mrf.mxu1 }
 0x365   :  { %429 = vst.msk [vmem:[#allocation11] sm:$0x1] %vm428_vm2, %v427_v50 }
 0x366   :  { %v418_v52 = vpop.f32.mrf.mxu1 }
 0x367   :  { %687 = shalt.err (!%p684_p1)
}
 0x368   :  { %439 = dma.vmem_to_hbm [thread:$0]  %s437_s28, 16, %s822_s6, [#allocation4]   ;;  %v545_v53 = vpop.f32.mrf.mxu1 }
 0x369   :  { %702 = dma.done.wait [#allocation4], 16  }
 0x36a   :  { %703 = vsyncadd [#allocation4], 4294967280 }
 0x36b   :  { %443 = vsyncpa [#allocation3], 1 }
 0x36c   :  { %444 = vsyncpa [#allocation6], 1 }
 0x36d   :  { %445 = vsyncpa [#allocation9], 1 }
 0x36e   :  { %446 = vsyncpa [#allocation4], 1 }

</bundles_post_ra>
